<compile_context>
chip_gen: v5e
topology: v5e:2x2
jax: 0.10.0
libtpu: 0.0.40
codegen_flags: <defaults>
</compile_context>

<pallas_src>
import jax
import jax.numpy as jnp
from jax import lax
from jax.experimental import pallas as pl
from jax.experimental.pallas import tpu as pltpu

IN_CH = 1
OUT_CH = 20
KSIZE = 28
N_PAD = 128      # lane-dense output-channel dim (20 real channels, rest zero)
TM_MAX = 512     # max rows of patches per grid step


def _round_up(x, m):
    return ((x + m - 1) // m) * m


def _cdiv(a, b):
    return -(-a // b)


def _pick_row_tile(m):
    """Rows of patches per grid step.

    - m <= 256: one step covering the whole (unpadded) row range.
    - m  > 256: >= 2 steps (lets v7x shard the 'parallel' axis across its two
      TensorCores), tile a multiple of 16 (bf16 sublane packing), capped at
      TM_MAX.  The last tile may be partial — Pallas boundary masking handles
      it, so no HBM row padding is ever materialized.
    """
    if m <= 256:
        return m
    steps = max(2, _cdiv(m, TM_MAX))
    return min(TM_MAX, _round_up(_cdiv(m, steps), 16))


def _conv_matmul_kernel(x_ref, w_ref, b_ref, o_ref):
    # x_ref: (tm, K)    f32 patches tile (cast to bf16 here, hidden under DMA)
    # w_ref: (K, N_PAD) bf16 flattened conv weight (resident across steps)
    # b_ref: (1, N_PAD) f32 bias (resident)
    # o_ref: (tm, N_PAD) f32
    x = x_ref[...].astype(jnp.bfloat16)
    acc = jnp.dot(x, w_ref[...], preferred_element_type=jnp.float32)
    o_ref[...] = acc + b_ref[...]


def _im2col(x_nchw, ksize):
    """(N, C, H, W) -> ((N*OH*OW, C*KH*KW), OH, OW) for a stride-1 VALID conv."""
    n, c, h, w = x_nchw.shape
    oh, ow = h - ksize + 1, w - ksize + 1
    if oh == 1 and ow == 1:
        # Full-image receptive field (MNIST-style 28x28): im2col is a reshape,
        # so the kernel reads the raw input exactly once.
        return x_nchw.reshape(n, c * ksize * ksize), oh, ow
    # TODO(synk): for OH*OW > 1 the patch extraction should move inside the
    # kernel (shift-and-matmul on a VMEM-resident image) to avoid the ~KSIZE^2x
    # HBM expansion; kept in XLA here since the module's intended 28x28 input
    # always hits the reshape path above.
    p = lax.conv_general_dilated_patches(
        x_nchw, (ksize, ksize), (1, 1), "VALID")          # (N, C*KH*KW, OH, OW)
    p = p.transpose(0, 2, 3, 1).reshape(n * oh * ow, c * ksize * ksize)
    return p, oh, ow


@jax.jit
def convnet_forward(x, weight, bias):
    """x: (N, 1, H, W) f32; weight: (20, 1, 28, 28) f32; bias: (20,) f32."""
    out_ch, in_ch, kh, kw = weight.shape
    n = x.shape[0]

    patches, oh, ow = _im2col(x, kh)                      # (M, C*KH*KW) f32
    m, k_raw = patches.shape
    assert k_raw == in_ch * kh * kw, (k_raw, in_ch, kh, kw)
    assert out_ch <= N_PAD, out_ch

    tm = _pick_row_tile(m)
    grid = (_cdiv(m, tm),)

    # Tiny one-time parameter prep (weights/bias are ~200 KiB total).
    w_mat = jnp.pad(weight.reshape(out_ch, k_raw).T,
                    ((0, 0), (0, N_PAD - out_ch))).astype(jnp.bfloat16)
    b_mat = jnp.pad(bias.reshape(1, out_ch),
                    ((0, 0), (0, N_PAD - out_ch))).astype(jnp.float32)

    out = pl.pallas_call(
        _conv_matmul_kernel,
        out_shape=jax.ShapeDtypeStruct((m, N_PAD), jnp.float32),
        grid_spec=pltpu.PrefetchScalarGridSpec(
            num_scalar_prefetch=0,
            grid=grid,
            in_specs=[
                pl.BlockSpec((tm, k_raw), lambda i: (i, 0)),      # f32 patches tile
                pl.BlockSpec((k_raw, N_PAD), lambda i: (0, 0)),   # bf16 weight (resident)
                pl.BlockSpec((1, N_PAD), lambda i: (0, 0)),       # f32 bias (resident)
            ],
            out_specs=pl.BlockSpec((tm, N_PAD), lambda i: (i, 0)),
        ),
        compiler_params=pltpu.CompilerParams(
            dimension_semantics=("parallel",)),
    )(patches, w_mat, b_mat)

    # Drop channel padding; (M, 20) -> (N, OH, OW, 20) -> NCHW.
    out = out[:, :out_ch].reshape(n, oh, ow, out_ch).transpose(0, 3, 1, 2)
    return out


def _reference_forward(x, weight, bias):
    out = lax.conv_general_dilated(
        x, weight, window_strides=(1, 1), padding="VALID",
        dimension_numbers=("NCHW", "OIHW", "NCHW"))
    return out + bias.reshape(1, OUT_CH, 1, 1)


if __name__ == "__main__":
    key = jax.random.PRNGKey(0)
    kx, kw_, kb, kx2 = jax.random.split(key, 4)

    # Parameters with nn.Conv2d(1, 20, kernel_size=28) shapes / init range.
    fan_in = IN_CH * KSIZE * KSIZE
    bound = 1.0 / (fan_in ** 0.5)
    weight = jax.random.uniform(kw_, (OUT_CH, IN_CH, KSIZE, KSIZE),
                                jnp.float32, -bound, bound)
    bias = jax.random.uniform(kb, (OUT_CH,), jnp.float32, -bound, bound)

    # MNIST-like input implied by the module: (N, 1, 28, 28).
    x = jax.random.normal(kx, (2, IN_CH, 28, 28), jnp.float32)

    # TODO(synk): plot_conv_filters_forward (logging/plotting side effect) has
    # no kernel equivalent and is skipped (log_filters=False in __init__ anyway).
    out = convnet_forward(x, weight, bias)
    jax.block_until_ready(out)
    ref = _reference_forward(x, weight, bias)
    assert out.shape == (2, OUT_CH, 1, 1), out.shape
    # bf16 MXU inputs bound the accuracy (same tolerance as before).
    assert jnp.allclose(out, ref, atol=3e-2, rtol=3e-2), \
        float(jnp.max(jnp.abs(out - ref)))

    # Second shape exercises the general im2col + partial-last-tile path.
    x2 = jax.random.normal(kx2, (2, IN_CH, 32, 32), jnp.float32)
    out2 = convnet_forward(x2, weight, bias)
    jax.block_until_ready(out2)
    ref2 = _reference_forward(x2, weight, bias)
    assert out2.shape == (2, OUT_CH, 5, 5), out2.shape
    assert jnp.allclose(out2, ref2, atol=3e-2, rtol=3e-2), \
        float(jnp.max(jnp.abs(out2 - ref2)))

    print("KERNEL_OK")
</pallas_src>

<mosaic_0001>
module attributes {stable_mosaic.version = 11 : i64} {
  func.func @_conv_matmul_kernel(%arg0: i32, %arg1: memref<2x784xf32, #tpu.memory_space<vmem>>, %arg2: memref<784x128xbf16, #tpu.memory_space<vmem>>, %arg3: memref<1x128xf32, #tpu.memory_space<vmem>>, %arg4: memref<2x128xf32, #tpu.memory_space<vmem>>) attributes {dimension_semantics = [#tpu.dimension_semantics<parallel>], iteration_bounds = array<i64: 1>, scalar_prefetch = 0 : i64, scratch_operands = 0 : i64, tpu.core_type = #tpu.core_type<tc>, window_params = [{transform_indices = @transform_0, window_bounds = array<i64: 2, 784>}, {pipeline_mode = #tpu.pipeline_mode<synchronous>, transform_indices = @transform_1, window_bounds = array<i64: 784, 128>}, {pipeline_mode = #tpu.pipeline_mode<synchronous>, transform_indices = @transform_2, window_bounds = array<i64: 1, 128>}, {transform_indices = @transform_3, window_bounds = array<i64: 2, 128>}]} {
    %c0 = arith.constant 0 : index
    %c0_0 = arith.constant 0 : index
    %0 = vector.load %arg1[%c0, %c0_0] : memref<2x784xf32, #tpu.memory_space<vmem>>, vector<2x784xf32>
    %1 = arith.truncf %0 : vector<2x784xf32> to vector<2x784xbf16>
    %c0_1 = arith.constant 0 : index
    %c0_2 = arith.constant 0 : index
    %2 = vector.load %arg2[%c0_1, %c0_2] : memref<784x128xbf16, #tpu.memory_space<vmem>>, vector<784x128xbf16>
    %cst = arith.constant dense<0.000000e+00> : vector<2x128xf32>
    %3 = tpu.matmul %1, %2, %cst {dimension_numbers = #tpu.dot_dimension_numbers<[1], [0], [0], [1], [0, 0, 1, 1], [], []>} : vector<2x784xbf16>, vector<784x128xbf16>, vector<2x128xf32> -> vector<2x128xf32>
    %c0_3 = arith.constant 0 : index
    %c0_4 = arith.constant 0 : index
    %4 = vector.load %arg3[%c0_3, %c0_4] : memref<1x128xf32, #tpu.memory_space<vmem>>, vector<1x128xf32>
    %5 = vector.broadcast %4 : vector<1x128xf32> to vector<2x128xf32>
    %6 = arith.addf %3, %5 : vector<2x128xf32>
    %c0_5 = arith.constant 0 : index
    %c0_6 = arith.constant 0 : index
    %7 = vector.load %arg4[%c0_5, %c0_6] : memref<2x128xf32, #tpu.memory_space<vmem>>, vector<2x128xf32>
    tpu.vector_store %arg4[%c0_5, %c0_6], %6 {strides = array<i32>} : memref<2x128xf32, #tpu.memory_space<vmem>>, vector<2x128xf32>,
    return
  }
  func.func @transform_0(%arg0: i32) -> (i32, i32) {
    %c0_i32 = arith.constant 0 : i32
    %c0_i32_0 = arith.constant 0 : i32
    return %arg0, %c0_i32 : i32, i32
  }
  func.func @transform_1(%arg0: i32) -> (i32, i32) {
    %c0_i32 = arith.constant 0 : i32
    %c0_i32_0 = arith.constant 0 : i32
    %c0_i32_1 = arith.constant 0 : i32
    return %c0_i32, %c0_i32_0 : i32, i32
  }
  func.func @transform_2(%arg0: i32) -> (i32, i32) {
    %c0_i32 = arith.constant 0 : i32
    %c0_i32_0 = arith.constant 0 : i32
    %c0_i32_1 = arith.constant 0 : i32
    return %c0_i32, %c0_i32_0 : i32, i32
  }
  func.func @transform_3(%arg0: i32) -> (i32, i32) {
    %c0_i32 = arith.constant 0 : i32
    %c0_i32_0 = arith.constant 0 : i32
    return %arg0, %c0_i32 : i32, i32
  }
}

</mosaic_0001>

<bundles_post_ra>
// kernel: convnet_forward.1
= control target key start
LH: loop header
LB: loop body
LE: loop exit
PB: predicated region body
PF: predicated region fallthrough
CT: control target
= control target key end

     0   :  { %s1006_s0 = inlined_call_operand.vmem [shape: f32[2,784], index: 0, kind: input, shape index: {}]   ;;  %s1007_s1 = inlined_call_operand.vmem [shape: bf16[784,128], index: 1, kind: input, shape index: {}]   ;;  %s1008_s2 = inlined_call_operand.vmem [shape: f32[1,128], index: 2, kind: input, shape index: {}]   ;;  %s1009_s3 = inlined_call_operand.hbm [shape: f32[2,128], index: 3, kind: output, shape index: {}]  }
   0x1   :  { %v756_v0 = vld [vmem:[%s1007_s1 + $0x38] sm:$0xff]  ;;  %v755_v3 = vld [vmem:[%s1007_s1 + $0x30] sm:$0xff]  ;;  %v754_v8 = vld [vmem:[%s1007_s1 + $0x28] sm:$0xff] }
   0x2   :  { %v764_v1 = vld [vmem:[%s1007_s1 + $0x78] sm:$0xff]  ;;  %444 = vmatpush.bf16.msra.mxu0 %v756_v0  ;;  %v763_v4 = vld [vmem:[%s1007_s1 + $0x70] sm:$0xff]  ;;  %v762_v9 = vld [vmem:[%s1007_s1 + $0x68] sm:$0xff] }
   0x3   :  { %v772_v2 = vld [vmem:[%s1007_s1 + $0xb8] sm:$0xff]  ;;  %457 = vmatpush.bf16.msra.mxu1 %v764_v1  ;;  %v771_v5 = vld [vmem:[%s1007_s1 + $0xb0] sm:$0xff]  ;;  %v770_v10 = vld [vmem:[%s1007_s1 + $0xa8] sm:$0xff] }
   0x4   :  { %470 = vmatpush.bf16.msra.mxu2 %v772_v2  ;;  %v780_v6 = vld [vmem:[%s1007_s1 + $0xf8] sm:$0xff]  ;;  %v779_v7 = vld [vmem:[%s1007_s1 + $0xf0] sm:$0xff]  ;;  %v778_v11 = vld [vmem:[%s1007_s1 + $0xe8] sm:$0xff] }
   0x5   :  { %483 = vmatpush.bf16.msra.mxu3 %v780_v6  ;;  %v753_v12 = vld [vmem:[%s1007_s1 + $0x20] sm:$0xff]  ;;  %v752_v16 = vld [vmem:[%s1007_s1 + $0x18] sm:$0xff]  ;;  %v17_v20 = vld [vmem:[%s1006_s0 + $0x8] sm:$0x3f] }
   0x6   :  { %445 = vmatpush.bf16.msra.mxu0 %v755_v3  ;;  %v761_v13 = vld [vmem:[%s1007_s1 + $0x60] sm:$0xff]  ;;  %v760_v18 = vld [vmem:[%s1007_s1 + $0x58] sm:$0xff]  ;;  %22 = vst [vmem:[#allocation1 + $0x20] ss:$4 sm:$0xff] %v17_v20 }
   0x7   :  { %458 = vmatpush.bf16.msra.mxu1 %v763_v4  ;;  %v16_v14 = vld [vmem:[%s1006_s0] sm:$0xff]  ;;  %v768_v19 = vld [vmem:[%s1007_s1 + $0x98] sm:$0xff] }
   0x8   :  { %471 = vmatpush.bf16.msra.mxu2 %v771_v5  ;;  %v769_v15 = vld [vmem:[%s1007_s1 + $0xa0] sm:$0xff]  ;;  %20 = vst [vmem:[#allocation1] ss:$4 sm:$0xff] %v16_v14 }
   0x9   :  { %484 = vmatpush.bf16.msra.mxu3 %v779_v7  ;;  %v777_v17 = vld [vmem:[%s1007_s1 + $0xe0] sm:$0xff] }
   0xa   :  { %446 = vmatpush.bf16.msra.mxu0 %v754_v8 }
   0xb   :  { %459 = vmatpush.bf16.msra.mxu1 %v762_v9 }
   0xc   :  { %472 = vmatpush.bf16.msra.mxu2 %v770_v10 }
   0xd   :  { %485 = vmatpush.bf16.msra.mxu3 %v778_v11 }
   0xe   :  { %447 = vmatpush.bf16.msra.mxu0 %v753_v12 }
   0xf   :  { %460 = vmatpush.bf16.msra.mxu1 %v761_v13 }
  0x10   :  { %473 = vmatpush.bf16.msra.mxu2 %v769_v15 }
  0x11   :  { %8 = vsyncpa [#allocation3], 0  ;;  %486 = vmatpush.bf16.msra.mxu3 %v777_v17  ;;  %v776_v21 = vld [vmem:[%s1007_s1 + $0xd8] sm:$0xff]  ;;  %v751_v22 = vld [vmem:[%s1007_s1 + $0x10] sm:$0xff]  ;;  %vm440_vm0 = vcmask 130048   ;;  %s543_s8 = sshll.u32 %s1009_s3, 4  ;;  %s544_s8 = int_to_ptr.hbm [resolvable:$true] %s543_s8 }
  0x12   :  { %448 = vmatpush.bf16.msra.mxu0 %v752_v16  ;;  %v759_v23 = vld [vmem:[%s1007_s1 + $0x50] sm:$0xff]  ;;  %v750_v26 = vld [vmem:[%s1007_s1 + $0x8] sm:$0xff]  ;;  %v749_v29 = vld [vmem:[%s1007_s1] sm:$0xff] }
  0x13   :  { %461 = vmatpush.bf16.msra.mxu1 %v760_v18  ;;  %v767_v24 = vld [vmem:[%s1007_s1 + $0x90] sm:$0xff]  ;;  %v758_v27 = vld [vmem:[%s1007_s1 + $0x48] sm:$0xff]  ;;  %v757_v30 = vld [vmem:[%s1007_s1 + $0x40] sm:$0xff] }
  0x14   :  { %474 = vmatpush.bf16.msra.mxu2 %v768_v19  ;;  %v775_v25 = vld [vmem:[%s1007_s1 + $0xd0] sm:$0xff]  ;;  %v766_v28 = vld [vmem:[%s1007_s1 + $0x88] sm:$0xff]  ;;  %v23_v32 = vld.sshfl [vmem:[#allocation1] sm:$0xff pattern:$0x73625140] }
  0x15   :  { %487 = vmatpush.bf16.msra.mxu3 %v776_v21  ;;  %v774_v31 = vld [vmem:[%s1007_s1 + $0xc8] sm:$0xff]  ;;  %v765_v34 = vld [vmem:[%s1007_s1 + $0x80] sm:$0xff]  ;;  %v788_v35 = vld [vmem:[%s1007_s1 + $0x138] sm:$0xff]  ;;  %v37_v39 = vpack.c.bf16 %v23_v32, %v23_v32 }
  0x16   :  { %449 = vmatpush.bf16.msra.mxu0 %v751_v22  ;;  %v24_v33 = vld.sshfl [vmem:[#allocation1 + $0x8] sm:$0xff pattern:$0x73625140]  ;;  %v25_v36 = vld.sshfl [vmem:[#allocation1 + $0x10] sm:$0xff pattern:$0x73625140] }
  0x17   :  { %462 = vmatpush.bf16.msra.mxu1 %v759_v23  ;;  %v796_v37 = vld [vmem:[%s1007_s1 + $0x178] sm:$0xff]  ;;  %v797_v38 = vld [vmem:[%s1007_s1 + $0x180] sm:$0xff]  ;;  %v38_v40 = vpack.c.bf16 %v24_v33, %v24_v33  ;;  %v39_v41 = vpack.c.bf16 %v25_v36, %v25_v36  ;;  %v787_v44 = vld [vmem:[%s1007_s1 + $0x130] sm:$0xff] }
  0x18   :  { %475 = vmatpush.bf16.msra.mxu2 %v767_v24  ;;  %v773_v42 = vld [vmem:[%s1007_s1 + $0xc0] sm:$0xff]  ;;  %v26_v43 = vld.sshfl [vmem:[#allocation1 + $0x18] sm:$0xff pattern:$0x73625140]  ;;  %v795_v45 = vld [vmem:[%s1007_s1 + $0x170] sm:$0xff] }
  0x19   :  { %488 = vmatpush.bf16.msra.mxu3 %v775_v25  ;;  %v40_v46 = vpack.c.bf16 %v26_v43, %v26_v43  ;;  %v786_v47 = vld [vmem:[%s1007_s1 + $0x128] sm:$0xff]  ;;  %v785_v49 = vld [vmem:[%s1007_s1 + $0x120] sm:$0xff]  ;;  %v784_v51 = vld [vmem:[%s1007_s1 + $0x118] sm:$0xff] }
  0x1a   :  { %450 = vmatpush.bf16.msra.mxu0 %v750_v26  ;;  %v794_v48 = vld [vmem:[%s1007_s1 + $0x168] sm:$0xff]  ;;  %v793_v50 = vld [vmem:[%s1007_s1 + $0x160] sm:$0xff]  ;;  %v29_v52 = vld.sshfl [vmem:[#allocation1 + $0x30] sm:$0xff pattern:$0x73625140] }
  0x1b   :  { %463 = vmatpush.bf16.msra.mxu1 %v758_v27  ;;  %v792_v53 = vld [vmem:[%s1007_s1 + $0x158] sm:$0xff]  ;;  %v43_v54 = vpack.c.bf16 %v29_v52, %v29_v52  ;;  %v783_v55 = vld [vmem:[%s1007_s1 + $0x110] sm:$0xff]  ;;  %v782_v57 = vld [vmem:[%s1007_s1 + $0x108] sm:$0xff] }
  0x1c   :  { %476 = vmatpush.bf16.msra.mxu2 %v766_v28  ;;  %v791_v56 = vld [vmem:[%s1007_s1 + $0x150] sm:$0xff]  ;;  %v790_v58 = vld [vmem:[%s1007_s1 + $0x148] sm:$0xff]  ;;  %v781_v59 = vld [vmem:[%s1007_s1 + $0x100] sm:$0xff] }
  0x1d   :  { %489 = vmatpush.bf16.msra.mxu3 %v774_v31  ;;  %v27_v60 = vld.sshfl [vmem:[#allocation1 + $0x20] sm:$0xff pattern:$0x73625140]  ;;  %v28_v62 = vld.sshfl [vmem:[#allocation1 + $0x28] sm:$0xff pattern:$0x73625140] }
  0x1e   :  { %451 = vmatpush.bf16.msra.mxu0 %v749_v29  ;;  %v789_v61 = vld [vmem:[%s1007_s1 + $0x140] sm:$0xff]  ;;  %v41_v63 = vpack.c.bf16 %v27_v60, %v27_v60  ;;  %v42_v0 = vpack.c.bf16 %v28_v62, %v28_v62  ;;  %s826_s1 = smov [#allocation2]  }
  0x1f   :  { %464 = vmatpush.bf16.msra.mxu1 %v757_v30  ;;  %v799_v7 = vld [vmem:[%s1008_s2] ss:$0 sm:$0xff]  ;;  %s541_s0 = sshll.u32 %s826_s1, 4  ;;  %s542_s0 = int_to_ptr.vmem [resolvable:$true] %s541_s0 }
  0x20   :  { %477 = vmatpush.bf16.msra.mxu2 %v765_v34 }
  0x21   :  { %452 = vmatmul.bf16.vlgmr.msra.gmra.mxu0 %v37_v39  ;;  %490 = vmatpush.bf16.msra.mxu3 %v773_v42 }
  0x22   :  { %496 = vmatpush.bf16.msrb.mxu0 %v788_v35  ;;  %465 = vmatmul.bf16.vlgmr.msra.gmra.mxu1 %v38_v40 }
  0x23   :  { %509 = vmatpush.bf16.msrb.mxu1 %v796_v37  ;;  %478 = vmatmul.bf16.vlgmr.msra.gmra.mxu2 %v39_v41 }
  0x24   :  { %529 = vmatpush.bf16.msrb.mxu2 %v797_v38  ;;  %491 = vmatmul.bf16.vlgmr.msra.gmra.mxu3 %v40_v46 }
  0x26   :  { %497 = vmatpush.bf16.msrb.mxu0 %v787_v44 }
  0x27   :  { %510 = vmatpush.bf16.msrb.mxu1 %v795_v45 }
  0x2a   :  { %498 = vmatpush.bf16.msrb.mxu0 %v786_v47 }
  0x2b   :  { %511 = vmatpush.bf16.msrb.mxu1 %v794_v48 }
  0x2e   :  { %499 = vmatpush.bf16.msrb.mxu0 %v785_v49 }
  0x2f   :  { %512 = vmatpush.bf16.msrb.mxu1 %v793_v50 }
  0x32   :  { %500 = vmatpush.bf16.msrb.mxu0 %v784_v51 }
  0x33   :  { %513 = vmatpush.bf16.msrb.mxu1 %v792_v53  ;;  %748 = vmatmul.msk.bf16.vlgmr.msrb.gmra.mxu2 %vm440_vm0, %v43_v54 }
  0x36   :  { %501 = vmatpush.bf16.msrb.mxu0 %v783_v55 }
  0x37   :  { %514 = vmatpush.bf16.msrb.mxu1 %v791_v56 }
  0x3a   :  { %502 = vmatpush.bf16.msrb.mxu0 %v782_v57 }
  0x3b   :  { %515 = vmatpush.bf16.msrb.mxu1 %v790_v58 }
  0x3e   :  { %503 = vmatpush.bf16.msrb.mxu0 %v781_v59 }
  0x3f   :  { %516 = vmatpush.bf16.msrb.mxu1 %v789_v61 }
  0x41   :  { %504 = vmatmul.bf16.vlgmr.msrb.gmra.mxu0 %v41_v63 }
  0x42   :  { %517 = vmatmul.bf16.vlgmr.msrb.gmra.mxu1 %v42_v0 }
  0x9e   :  { %v453_v1 = vpop.f32.mrf.mxu0 }
  0x9f   :  { %v466_v2 = vpop.f32.mrf.mxu1  ;;  %v454_v9 = vadd.f32 %v799_v7, %v453_v1 }
  0xa1   :  { %v467_v11 = vadd.f32 %v466_v2, %v454_v9 }
  0xa6   :  { %v479_v3 = vpop.f32.mrf.mxu2  ;;  %v455_v4 = vpop.f32.mrf.mxu0 }
  0xa7   :  { %v468_v5 = vpop.f32.mrf.mxu1  ;;  %v492_v6 = vpop.f32.mrf.mxu3  ;;  %v480_v13 = vadd.f32 %v479_v3, %v467_v11 }
  0xa9   :  { %v493_v14 = vadd.f32 %v492_v6, %v480_v13 }
  0xae   :  { %v481_v8 = vpop.f32.mrf.mxu2 }
  0xaf   :  { %v494_v10 = vpop.f32.mrf.mxu3 }
  0xb6   :  { %v531_v12 = vpop.f32.mrf.mxu2 }
  0xbe   :  { %v505_v15 = vpop.f32.mrf.mxu0  ;;  %v533_v18 = vpop.f32.mrf.mxu2 }
  0xbf   :  { %v506_v16 = vadd.f32 %v505_v15, %v493_v14  ;;  %v518_v17 = vpop.f32.mrf.mxu1 }
  0xc1   :  { %v519_v19 = vadd.f32 %v518_v17, %v506_v16 }
  0xc3   :  { %v532_v20 = vadd.f32 %v531_v12, %v519_v19 }
  0xc5   :  { %535 = vst [vmem:[#allocation2] sm:$0x3] %v532_v20 }
  0xc6   :  { %v507_v21 = vpop.f32.mrf.mxu0  ;;  %546 = dma.vmem_to_hbm [thread:$0]  %s542_s0, 32, %s544_s8, [#allocation3]  }
  0xc7   :  { %v520_v22 = vpop.f32.mrf.mxu1 }
  0xc8   :  { %824 = dma.done.wait [#allocation3], 32  }
  0xc9   :  { %825 = vsyncadd [#allocation3], 4294967264 }
  0xca   :  { %551 = vsyncpa [#allocation3], 1 }

</bundles_post_ra>
